<compile_context>
chip_gen: v5e
topology: v5e:2x2
jax: 0.10.0
libtpu: 0.0.40
codegen_flags: <defaults>
</compile_context>

<pallas_src>
import functools

import jax
import jax.numpy as jnp
from jax.experimental import pallas as pl
from jax.experimental.pallas import tpu as pltpu


def _round_up(x, m):
    return (x + m - 1) // m * m


def _vmem_capacity_bytes():
    try:
        return int(pltpu.get_tpu_info().vmem_capacity_bytes)
    except Exception:
        return 64 << 20  # conservative default: v7x per-TensorCore VMEM


def _activation(y, act):
    if act == 'silu':
        return y * jax.nn.sigmoid(y)
    if act == 'relu':
        return jnp.maximum(y, 0.0)
    if act == 'tanh':
        return jnp.tanh(y)
    if act == 'gelu':
        # torch.nn.GELU default is the exact erf form.
        return jax.nn.gelu(y, approximate=False)
    if act == 'elu':
        return jnp.where(y > 0, y, jnp.expm1(y))
    raise ValueError(f'Unknown activation: {act}')


def _epilogue(y, b, g, beta, *, valid_out_dim, layer_norm, act):
    """bias -> [LayerNorm] -> activation, all in f32.

    Padded feature columns of y are exactly zero (zero-padded W/bias), so
    dividing by the *true* out_dim gives the correct LN statistics and the
    padded outputs stay zero (sliced off in the wrapper).
    """
    y = y + b
    if layer_norm:
        inv_n = jnp.float32(1.0 / valid_out_dim)
        s = jnp.sum(y, axis=-1, keepdims=True)
        sq = jnp.sum(y * y, axis=-1, keepdims=True)
        mean = s * inv_n
        var = jnp.maximum(sq * inv_n - mean * mean, 0.0)  # clamp: E[y^2]-mean^2 can cancel
        y = (y - mean) * jax.lax.rsqrt(var + jnp.float32(1e-5))
        y = y * g + beta
    y = _activation(y, act)
    # TODO(synk): dropout > 0.0 (training mode) would need pltpu.prng_* masking;
    # the module default dropout=0.0 is an identity and is omitted here.
    return y


def _mlp_resident_kernel(x_ref, w_ref, b_ref, g_ref, beta_ref, o_ref, *,
                         valid_out_dim, layer_norm, act, compute_dtype):
    # Cast x to the MXU compute dtype on the VPU (free slot) instead of in HBM.
    xv = x_ref[...].astype(compute_dtype)
    y = jnp.dot(xv, w_ref[...], preferred_element_type=jnp.float32)
    y = _epilogue(y, b_ref[...], g_ref[...], beta_ref[...],
                  valid_out_dim=valid_out_dim, layer_norm=layer_norm, act=act)
    o_ref[...] = y.astype(o_ref.dtype)


def _mlp_ktiled_kernel(x_ref, w_ref, b_ref, g_ref, beta_ref, o_ref, acc_ref, *,
                       valid_out_dim, layer_norm, act, compute_dtype):
    k = pl.program_id(1)

    @pl.when(k == 0)
    def _():
        acc_ref[...] = jnp.zeros_like(acc_ref)

    xv = x_ref[...].astype(compute_dtype)
    acc_ref[...] += jnp.dot(xv, w_ref[...], preferred_element_type=jnp.float32)

    @pl.when(k == pl.num_programs(1) - 1)
    def _():
        y = _epilogue(acc_ref[...], b_ref[...], g_ref[...], beta_ref[...],
                      valid_out_dim=valid_out_dim, layer_norm=layer_norm, act=act)
        o_ref[...] = y.astype(o_ref.dtype)


def prepare_mlp_params(weight, bias, gamma=None, beta=None, *,
                       compute_dtype=jnp.bfloat16, tile_k=None):
    """One-time parameter transform (transpose + pad + cast).

    Hoist this out of the hot path (call once per layer, reuse across calls) and
    pass the result to mlp_block(..., prepared=...) to avoid an extra HBM
    read+write of the weight on every forward call.
    """
    out_dim, in_dim = weight.shape
    n_pad = _round_up(out_dim, 128)            # lane-dense feature axis
    c_bytes = jnp.dtype(compute_dtype).itemsize
    cap = _vmem_capacity_bytes()

    if tile_k is None:
        # Keep the weight resident only if it comfortably fits VMEM alongside the
        # double-buffered x/out tiles; otherwise stream it along a K grid axis.
        if _round_up(in_dim, 128) * n_pad * c_bytes > int(0.4 * cap):
            tile_k = max(128, min(_round_up(in_dim, 128),
                                  (8 << 20) // (n_pad * c_bytes) // 128 * 128))
    if tile_k is not None:
        tile_k = _round_up(tile_k, 128)
        k_pad = _round_up(in_dim, tile_k)
    else:
        k_pad = _round_up(in_dim, 128)         # MXU-friendly contraction axis

    if gamma is None:
        gamma = jnp.ones((out_dim,), jnp.float32)
    if beta is None:
        beta = jnp.zeros((out_dim,), jnp.float32)

    # Zero padding keeps semantics exact (padded rows/columns are discarded).
    wp = jnp.pad(weight.T, ((0, k_pad - in_dim), (0, n_pad - out_dim))).astype(compute_dtype)
    bp = jnp.pad(bias.astype(jnp.float32), (0, n_pad - out_dim)).reshape(1, n_pad)
    gp = jnp.pad(gamma.astype(jnp.float32), (0, n_pad - out_dim)).reshape(1, n_pad)
    betap = jnp.pad(beta.astype(jnp.float32), (0, n_pad - out_dim)).reshape(1, n_pad)

    return dict(wp=wp, bp=bp, gp=gp, betap=betap, in_dim=in_dim, out_dim=out_dim,
                k_pad=k_pad, n_pad=n_pad, tile_k=tile_k, compute_dtype=compute_dtype)


def mlp_block(x, weight=None, bias=None, gamma=None, beta=None, *, layer_norm=False,
              act='silu', block_batch=None, tile_k=None,
              compute_dtype=jnp.bfloat16, out_dtype=None, prepared=None):
    """x: (B, in_dim); weight: (out_dim, in_dim), bias: (out_dim,) as torch.nn.Linear."""
    if prepared is None:
        prepared = prepare_mlp_params(weight, bias, gamma, beta,
                                      compute_dtype=compute_dtype, tile_k=tile_k)
    wp, bp, gp, betap = prepared['wp'], prepared['bp'], prepared['gp'], prepared['betap']
    in_dim, out_dim = prepared['in_dim'], prepared['out_dim']
    k_pad, n_pad = prepared['k_pad'], prepared['n_pad']
    tile_k = prepared['tile_k']
    compute_dtype = prepared['compute_dtype']

    B = x.shape[0]
    assert x.shape[1] == in_dim
    out_dtype = x.dtype if out_dtype is None else out_dtype
    x_bytes = jnp.dtype(x.dtype).itemsize
    c_bytes = jnp.dtype(compute_dtype).itemsize
    o_bytes = jnp.dtype(out_dtype).itemsize
    cap = _vmem_capacity_bytes()

    # ---- batch tiling: aim for >= 2 grid steps so the "parallel" axis can shard
    # across 2 TensorCores (v7x megacore) and the x/out tiles double-buffer.
    if block_batch is None:
        block_batch = min(256, max(16, _round_up(-(-B // 2), 16)))
    block_batch = min(_round_up(block_batch, 16), _round_up(B, 16))
    b_pad = _round_up(B, block_batch)

    # Stream x at its native dtype (cast to compute_dtype inside the kernel).
    xp = jnp.pad(x, ((0, b_pad - B), (0, k_pad - in_dim)))

    const_row = dict(pipeline_mode=pl.Buffered(1))  # single-buffer constant-index inputs

    if tile_k is None:
        # ---------------- resident-weight path ----------------
        grid = (b_pad // block_batch,)
        needed = (k_pad * n_pad * c_bytes                 # single-buffered resident weight
                  + 2 * block_batch * k_pad * x_bytes     # double-buffered x tile
                  + 2 * block_batch * n_pad * o_bytes     # double-buffered out tile
                  + 4 * block_batch * n_pad * 4           # f32 intermediates headroom
                  + 3 * 2 * n_pad * 4)                    # bias/gamma/beta rows
        kernel = functools.partial(_mlp_resident_kernel, valid_out_dim=out_dim,
                                   layer_norm=layer_norm, act=act,
                                   compute_dtype=compute_dtype)
        grid_spec = pltpu.PrefetchScalarGridSpec(
            num_scalar_prefetch=0, grid=grid,
            in_specs=[
                pl.BlockSpec((block_batch, k_pad), lambda i: (i, 0)),          # streamed x
                pl.BlockSpec((k_pad, n_pad), lambda i: (0, 0), **const_row),   # weight
                pl.BlockSpec((1, n_pad), lambda i: (0, 0), **const_row),       # bias
                pl.BlockSpec((1, n_pad), lambda i: (0, 0), **const_row),       # gamma
                pl.BlockSpec((1, n_pad), lambda i: (0, 0), **const_row),       # beta
            ],
            out_specs=pl.BlockSpec((block_batch, n_pad), lambda i: (i, 0)),
        )
        dim_sem = ("parallel",)
        weight_stream_bytes = k_pad * n_pad * c_bytes
    else:
        # ---------------- K-tiled path (weight too large to sit in VMEM) ----------------
        num_k = k_pad // tile_k
        grid = (b_pad // block_batch, num_k)
        needed = (2 * tile_k * n_pad * c_bytes             # double-buffered weight tile
                  + 2 * block_batch * tile_k * x_bytes     # double-buffered x tile
                  + block_batch * n_pad * 4                # f32 accumulator scratch
                  + 2 * block_batch * n_pad * o_bytes      # double-buffered out tile
                  + 4 * block_batch * n_pad * 4            # f32 intermediates headroom
                  + 3 * 2 * n_pad * 4)
        kernel = functools.partial(_mlp_ktiled_kernel, valid_out_dim=out_dim,
                                   layer_norm=layer_norm, act=act,
                                   compute_dtype=compute_dtype)
        grid_spec = pltpu.PrefetchScalarGridSpec(
            num_scalar_prefetch=0, grid=grid,
            in_specs=[
                pl.BlockSpec((block_batch, tile_k), lambda i, k: (i, k)),
                pl.BlockSpec((tile_k, n_pad), lambda i, k: (k, 0)),
                pl.BlockSpec((1, n_pad), lambda i, k: (0, 0), **const_row),
                pl.BlockSpec((1, n_pad), lambda i, k: (0, 0), **const_row),
                pl.BlockSpec((1, n_pad), lambda i, k: (0, 0), **const_row),
            ],
            out_specs=pl.BlockSpec((block_batch, n_pad), lambda i, k: (i, 0)),
            scratch_shapes=[pltpu.VMEM((block_batch, n_pad), jnp.float32)],
        )
        dim_sem = ("parallel", "arbitrary")
        weight_stream_bytes = k_pad * n_pad * c_bytes * (b_pad // block_batch)

    # Cap the VMEM request below the physical per-core capacity (v7x: 64 MiB).
    vmem_limit = min(int(0.75 * cap), max(32 << 20, int(1.3 * needed)))

    cost = pl.CostEstimate(
        flops=2 * B * in_dim * out_dim + (8 * B * out_dim if layer_norm else 0),
        transcendentals=0 if act == 'relu' else B * out_dim,
        bytes_accessed=(b_pad * k_pad * x_bytes
                        + weight_stream_bytes
                        + b_pad * n_pad * o_bytes),
    )

    out = pl.pallas_call(
        kernel,
        out_shape=jax.ShapeDtypeStruct((b_pad, n_pad), out_dtype),
        grid_spec=grid_spec,
        compiler_params=pltpu.CompilerParams(
            dimension_semantics=dim_sem,
            vmem_limit_bytes=vmem_limit,
        ),
        cost_estimate=cost,
    )(xp, wp, bp, gp, betap)

    return out[:B, :out_dim]


def mlp_block_ref(x, weight, bias, gamma, beta, *, layer_norm=False, act='silu',
                  compute_dtype=None):
    """Pure-JAX reference (optionally with inputs rounded to compute_dtype)."""
    if compute_dtype is not None:
        x = x.astype(compute_dtype).astype(jnp.float32)
        weight = weight.astype(compute_dtype).astype(jnp.float32)
    y = x @ weight.T + bias
    if layer_norm:
        mean = jnp.mean(y, axis=-1, keepdims=True)
        var = jnp.mean((y - mean) ** 2, axis=-1, keepdims=True)
        y = (y - mean) * jax.lax.rsqrt(var + 1e-5)
        y = y * gamma + beta
    return _activation(y, act)


if __name__ == "__main__":
    def make_params(key, B, in_dim, out_dim):
        kx, kw, kb = jax.random.split(key, 3)
        bound = 1.0 / (in_dim ** 0.5)
        x = jax.random.normal(kx, (B, in_dim), jnp.float32)
        weight = jax.random.uniform(kw, (out_dim, in_dim), jnp.float32, -bound, bound)
        bias = jax.random.uniform(kb, (out_dim,), jnp.float32, -bound, bound)
        return x, weight, bias

    # --- Test 1: module default config (layer_norm=False, silu), small unaligned dims.
    B, in_dim, out_dim = 8, 32, 64
    x, weight, bias = make_params(jax.random.PRNGKey(0), B, in_dim, out_dim)
    gamma = jnp.ones((out_dim,), jnp.float32)
    beta = jnp.zeros((out_dim,), jnp.float32)

    out1 = jax.block_until_ready(mlp_block(x, weight, bias, layer_norm=False, act='silu'))
    ref1 = mlp_block_ref(x, weight, bias, gamma, beta, layer_norm=False, act='silu',
                         compute_dtype=jnp.bfloat16)
    assert out1.shape == (B, out_dim)
    assert jnp.allclose(out1, ref1, atol=2e-3, rtol=2e-3), \
        float(jnp.max(jnp.abs(out1 - ref1)))

    # --- Test 2: ragged batch, multiple pipelined grid steps, affine LayerNorm.
    B2, in2, out2 = 200, 128, 192
    x2, w2, b2 = make_params(jax.random.PRNGKey(1), B2, in2, out2)
    g2 = 1.0 + 0.1 * jax.random.normal(jax.random.PRNGKey(2), (out2,), jnp.float32)
    be2 = 0.1 * jax.random.normal(jax.random.PRNGKey(3), (out2,), jnp.float32)

    out2_ = jax.block_until_ready(
        mlp_block(x2, w2, b2, g2, be2, layer_norm=True, act='silu', block_batch=64))
    ref2 = mlp_block_ref(x2, w2, b2, g2, be2, layer_norm=True, act='silu',
                         compute_dtype=jnp.bfloat16)
    assert out2_.shape == (B2, out2)
    assert jnp.allclose(out2_, ref2, atol=2e-3, rtol=2e-3), \
        float(jnp.max(jnp.abs(out2_ - ref2)))

    # --- Test 3: force the K-tiled accumulator path (large-weight fallback), with
    # pre-prepared (hoisted) parameters and LayerNorm on.
    B3, in3, out3 = 48, 256, 192
    x3, w3, b3 = make_params(jax.random.PRNGKey(4), B3, in3, out3)
    g3 = 1.0 + 0.1 * jax.random.normal(jax.random.PRNGKey(5), (out3,), jnp.float32)
    be3 = 0.1 * jax.random.normal(jax.random.PRNGKey(6), (out3,), jnp.float32)
    prepped = prepare_mlp_params(w3, b3, g3, be3, tile_k=128)   # 2 K steps
    out3_ = jax.block_until_ready(
        mlp_block(x3, prepared=prepped, layer_norm=True, act='gelu'))
    ref3 = mlp_block_ref(x3, w3, b3, g3, be3, layer_norm=True, act='gelu',
                         compute_dtype=jnp.bfloat16)
    assert out3_.shape == (B3, out3)
    assert jnp.allclose(out3_, ref3, atol=2e-3, rtol=2e-3), \
        float(jnp.max(jnp.abs(out3_ - ref3)))

    print("KERNEL_OK")
</pallas_src>

<mosaic_0001>
module attributes {stable_mosaic.version = 11 : i64} {
  func.func @_mlp_resident_kernel(%arg0: i32, %arg1: memref<16x128xf32, #tpu.memory_space<vmem>>, %arg2: memref<128x128xbf16, #tpu.memory_space<vmem>>, %arg3: memref<1x128xf32, #tpu.memory_space<vmem>>, %arg4: memref<1x128xf32, #tpu.memory_space<vmem>>, %arg5: memref<1x128xf32, #tpu.memory_space<vmem>>, %arg6: memref<16x128xf32, #tpu.memory_space<vmem>>) attributes {dimension_semantics = [#tpu.dimension_semantics<parallel>], iteration_bounds = array<i64: 1>, scalar_prefetch = 0 : i64, scratch_operands = 0 : i64, tpu.core_type = #tpu.core_type<tc>, window_params = [{transform_indices = @transform_0, window_bounds = array<i64: 16, 128>}, {pipeline_mode = #tpu.pipeline_mode<synchronous>, transform_indices = @transform_1, window_bounds = array<i64: 128, 128>}, {pipeline_mode = #tpu.pipeline_mode<synchronous>, transform_indices = @transform_2, window_bounds = array<i64: 1, 128>}, {pipeline_mode = #tpu.pipeline_mode<synchronous>, transform_indices = @transform_3, window_bounds = array<i64: 1, 128>}, {pipeline_mode = #tpu.pipeline_mode<synchronous>, transform_indices = @transform_4, window_bounds = array<i64: 1, 128>}, {transform_indices = @transform_5, window_bounds = array<i64: 16, 128>}]} {
    %c0 = arith.constant 0 : index
    %c0_0 = arith.constant 0 : index
    %0 = vector.load %arg1[%c0, %c0_0] : memref<16x128xf32, #tpu.memory_space<vmem>>, vector<16x128xf32>
    %1 = arith.truncf %0 : vector<16x128xf32> to vector<16x128xbf16>
    %c0_1 = arith.constant 0 : index
    %c0_2 = arith.constant 0 : index
    %2 = vector.load %arg2[%c0_1, %c0_2] : memref<128x128xbf16, #tpu.memory_space<vmem>>, vector<128x128xbf16>
    %cst = arith.constant dense<0.000000e+00> : vector<16x128xf32>
    %3 = tpu.matmul %1, %2, %cst {dimension_numbers = #tpu.dot_dimension_numbers<[1], [0], [0], [1], [0, 0, 1, 1], [], []>} : vector<16x128xbf16>, vector<128x128xbf16>, vector<16x128xf32> -> vector<16x128xf32>
    %c0_3 = arith.constant 0 : index
    %c0_4 = arith.constant 0 : index
    %4 = vector.load %arg3[%c0_3, %c0_4] : memref<1x128xf32, #tpu.memory_space<vmem>>, vector<1x128xf32>
    %5 = vector.broadcast %4 : vector<1x128xf32> to vector<16x128xf32>
    %6 = arith.addf %3, %5 : vector<16x128xf32>
    %7 = arith.negf %6 : vector<16x128xf32>
    %8 = math.exp %7 : vector<16x128xf32>
    %cst_5 = arith.constant 1.000000e+00 : f32
    %9 = vector.broadcast %cst_5 : f32 to vector<16x128xf32>
    %10 = arith.addf %9, %8 : vector<16x128xf32>
    %11 = arith.divf %9, %10 : vector<16x128xf32>
    %12 = arith.mulf %6, %11 : vector<16x128xf32>
    %c0_6 = arith.constant 0 : index
    %c0_7 = arith.constant 0 : index
    %13 = vector.load %arg6[%c0_6, %c0_7] : memref<16x128xf32, #tpu.memory_space<vmem>>, vector<16x128xf32>
    tpu.vector_store %arg6[%c0_6, %c0_7], %12 {strides = array<i32>} : memref<16x128xf32, #tpu.memory_space<vmem>>, vector<16x128xf32>,
    return
  }
  func.func @transform_0(%arg0: i32) -> (i32, i32) {
    %c0_i32 = arith.constant 0 : i32
    %c0_i32_0 = arith.constant 0 : i32
    return %arg0, %c0_i32 : i32, i32
  }
  func.func @transform_1(%arg0: i32) -> (i32, i32) {
    %c0_i32 = arith.constant 0 : i32
    %c0_i32_0 = arith.constant 0 : i32
    %c0_i32_1 = arith.constant 0 : i32
    return %c0_i32, %c0_i32_0 : i32, i32
  }
  func.func @transform_2(%arg0: i32) -> (i32, i32) {
    %c0_i32 = arith.constant 0 : i32
    %c0_i32_0 = arith.constant 0 : i32
    %c0_i32_1 = arith.constant 0 : i32
    return %c0_i32, %c0_i32_0 : i32, i32
  }
  func.func @transform_3(%arg0: i32) -> (i32, i32) {
    %c0_i32 = arith.constant 0 : i32
    %c0_i32_0 = arith.constant 0 : i32
    %c0_i32_1 = arith.constant 0 : i32
    return %c0_i32, %c0_i32_0 : i32, i32
  }
  func.func @transform_4(%arg0: i32) -> (i32, i32) {
    %c0_i32 = arith.constant 0 : i32
    %c0_i32_0 = arith.constant 0 : i32
    %c0_i32_1 = arith.constant 0 : i32
    return %c0_i32, %c0_i32_0 : i32, i32
  }
  func.func @transform_5(%arg0: i32) -> (i32, i32) {
    %c0_i32 = arith.constant 0 : i32
    %c0_i32_0 = arith.constant 0 : i32
    return %arg0, %c0_i32 : i32, i32
  }
}

</mosaic_0001>

<bundles_post_ra>
// kernel: tpu_custom_call.1
= control target key start
LH: loop header
LB: loop body
LE: loop exit
PB: predicated region body
PF: predicated region fallthrough
CT: control target
= control target key end

     0   :  { %10 = vsyncpa [#allocation3], 0  ;;  %s391_s0 = inlined_call_operand.hbm [shape: f32[16,128], index: 0, kind: input, shape index: {}]   ;;  %s392_s1 = inlined_call_operand.hbm [shape: bf16[128,128], index: 1, kind: input, shape index: {}]   ;;  %s393_s2 = inlined_call_operand.vmem [shape: f32[1,128], index: 2, kind: input, shape index: {}]   ;;  %s394_s3 = inlined_call_operand.vmem [shape: f32[1,128], index: 3, kind: input, shape index: {}]   ;;  %s395_s4 = inlined_call_operand.vmem [shape: f32[1,128], index: 4, kind: input, shape index: {}]   ;;  %s396_s5 = inlined_call_operand.hbm [shape: f32[16,128], index: 5, kind: output, shape index: {}]  }
   0x1   :  { %11 = vsyncpa [#allocation6], 0 }
   0x2   :  { %12 = vsyncpa [#allocation4], 0  ;;  %s17_s20 = sshll.u32 %s391_s0, 4  ;;  %s336_s21 = smov [#allocation2]   ;;  %s18_s20 = int_to_ptr.hbm [resolvable:$true] %s17_s20 }
   0x3   :  { %s19_s22 = sshll.u32 %s336_s21, 4  ;;  %s30_s3 = sshll.u32 %s392_s1, 4  ;;  %s20_s22 = int_to_ptr.vmem [resolvable:$true] %s19_s22  ;;  %s31_s3 = int_to_ptr.hbm [resolvable:$true] %s30_s3 }
   0x4   :  { %s337_s25 = smov 128   ;;  %s338_s4 = smov 8  }
   0x5   :  { %25 = dma.hbm_to_vmem [thread:$0]  %s18_s20, 256, %s20_s22, [#allocation3], %s337_s25, %s337_s25, %s338_s4  }
   0x6   :  { %s339_s26 = smov [#allocation5]   ;;  %s340_s28 = smov 64  }
   0x7   :  { %s32_s27 = sshll.u32 %s339_s26, 4  ;;  %s341_s0 = smov 4   ;;  %s33_s27 = int_to_ptr.vmem [resolvable:$true] %s32_s27 }
   0x8   :  { %38 = dma.hbm_to_vmem [thread:$0]  %s31_s3, 1024, %s33_s27, [#allocation6], %s340_s28, %s340_s28, %s341_s0  }
   0x9   :  { %330 = dma.done.wait [#allocation3], 256  }
   0xa   :  { %331 = vsyncadd [#allocation3], 4294967040 }
   0xb   :  { %332 = dma.done.wait [#allocation6], 1024  }
   0xc   :  { %333 = vsyncadd [#allocation6], 4294966272  ;;  %v241_v0 = vld [vmem:[#allocation5 + $0x38] sm:$0xff]  ;;  %v240_v1 = vld [vmem:[#allocation5 + $0x30] sm:$0xff]  ;;  %s186_s8 = sshll.u32 %s396_s5, 4  ;;  %s187_s8 = int_to_ptr.hbm [resolvable:$true] %s186_s8 }
   0xd   :  { %124 = vmatpush.bf16.msra.mxu0 %v241_v0  ;;  %v239_v2 = vld [vmem:[#allocation5 + $0x28] sm:$0xff]  ;;  %v238_v3 = vld [vmem:[#allocation5 + $0x20] sm:$0xff]  ;;  %v237_v4 = vld [vmem:[#allocation5 + $0x18] sm:$0xff] }
   0xe   :  { %v236_v5 = vld [vmem:[#allocation5 + $0x10] sm:$0xff]  ;;  %v235_v6 = vld [vmem:[#allocation5 + $0x8] sm:$0xff]  ;;  %v234_v7 = vld [vmem:[#allocation5] sm:$0xff] }
   0xf   :  { %v53_v8 = vld [vmem:[#allocation2] sm:$0xff]  ;;  %v54_v9 = vld [vmem:[#allocation2 + $0x8] sm:$0xff] }
  0x10   :  { %v55_v10 = vpack.c.bf16 %v54_v9, %v53_v8  ;;  %v249_v11 = vld [vmem:[%s393_s2] ss:$0 sm:$0xff]  ;;  %s342_s2 = smov [#allocation7]  }
  0x11   :  { %125 = vmatpush.bf16.msra.mxu0 %v240_v1  ;;  %s184_s30 = sshll.u32 %s342_s2, 4  ;;  %s185_s30 = int_to_ptr.vmem [resolvable:$true] %s184_s30 }
  0x15   :  { %126 = vmatpush.bf16.msra.mxu0 %v239_v2 }
  0x19   :  { %127 = vmatpush.bf16.msra.mxu0 %v238_v3 }
  0x1d   :  { %128 = vmatpush.bf16.msra.mxu0 %v237_v4 }
  0x21   :  { %129 = vmatpush.bf16.msra.mxu0 %v236_v5 }
  0x25   :  { %130 = vmatpush.bf16.msra.mxu0 %v235_v6 }
  0x29   :  { %131 = vmatpush.bf16.msra.mxu0 %v234_v7 }
  0x2c   :  { %132 = vmatmul.bf16.vlgmr.msra.gmra.mxu0 %v55_v10 }
  0xa9   :  { %v133_v12 = vpop.f32.mrf.mxu0 }
  0xaa   :  { %v134_v13 = vadd.f32 %v249_v11, %v133_v12 }
  0xac   :  { %v232_v14 = vmul.f32 -1.442695, %v134_v13 }
  0xae   :  { %250 = vpow2.f32 %v232_v14 }
  0xb1   :  { %v135_v15 = vpop.f32.mrf.mxu0 }
  0xb2   :  { %v136_v16 = vadd.f32 %v249_v11, %v135_v15 }
  0xb4   :  { %v251_v17 = vpop.eup %250  ;;  %v233_v18 = vmul.f32 -1.442695, %v136_v16 }
  0xb5   :  { %v144_v19 = vadd.f32 1.0, %v251_v17 }
  0xb6   :  { %252 = vpow2.f32 %v233_v18 }
  0xb7   :  { %254 = vrcp.f32 %v144_v19  ;;  %v157_v25 = vand.u32 2147483648, %v144_v19  ;;  %v155_v27 = vand.u32 2147483647, %v144_v19  ;;  %vm151_vm1 = vweird.f32 %v144_v19 }
  0xb9   :  { %v158_v30 = vor.u32 1.1754944e-38, %v157_v25  ;;  %vm156_vm3 = vcmp.eq.f32.partialorder %v155_v27, 8.507059e+37 }
  0xbc   :  { %v253_v20 = vpop.eup %252 }
  0xbd   :  { %v255_v21 = vpop.eup %254  ;;  %v145_v22 = vadd.f32 1.0, %v253_v20 }
  0xbe   :  { %v147_v23 = vmul.f32 %v255_v21, %v144_v19  ;;  %vm152_vm0 = vweird.f32 %v255_v21 }
  0xbf   :  { %256 = vrcp.f32 %v145_v22  ;;  %vm153_vm2 = vmor %vm151_vm1, %vm152_vm0  ;;  %v172_v36 = vand.u32 2147483648, %v145_v22  ;;  %v170_v38 = vand.u32 2147483647, %v145_v22  ;;  %vm166_vm5 = vweird.f32 %v145_v22 }
  0xc0   :  { %v148_v24 = vsub.f32 1.0, %v147_v23 }
  0xc1   :  { %v173_v40 = vor.u32 1.1754944e-38, %v172_v36  ;;  %vm171_vm7 = vcmp.eq.f32.partialorder %v170_v38, 8.507059e+37 }
  0xc2   :  { %v149_v26 = vmul.f32 %v255_v21, %v148_v24 }
  0xc4   :  { %v150_v28 = vadd.f32 %v255_v21, %v149_v26 }
  0xc5   :  { %v257_v29 = vpop.eup %256 }
  0xc6   :  { %v154_v31 = vsel %vm153_vm2, %v255_v21, %v150_v28  ;;  %v162_v32 = vmul.f32 %v257_v29, %v145_v22  ;;  %vm167_vm4 = vweird.f32 %v257_v29 }
  0xc7   :  { %v159_v33 = vsel %vm156_vm3, %v158_v30, %v154_v31  ;;  %vm168_vm6 = vmor %vm166_vm5, %vm167_vm4 }
  0xc8   :  { %v176_v34 = vmul.f32 %v159_v33, %v134_v13  ;;  %v163_v35 = vsub.f32 1.0, %v162_v32 }
  0xca   :  { %178 = vst [vmem:[#allocation7] sm:$0xff] %v176_v34  ;;  %v164_v37 = vmul.f32 %v257_v29, %v163_v35 }
  0xcc   :  { %v165_v39 = vadd.f32 %v257_v29, %v164_v37 }
  0xce   :  { %v169_v41 = vsel %vm168_vm6, %v257_v29, %v165_v39 }
  0xcf   :  { %v174_v42 = vsel %vm171_vm7, %v173_v40, %v169_v41 }
  0xd0   :  { %v177_v43 = vmul.f32 %v174_v42, %v136_v16 }
  0xd2   :  { %179 = vst [vmem:[#allocation7 + $0x8] sm:$0xff] %v177_v43 }
  0xd3   :  { %192 = dma.vmem_to_hbm [thread:$0]  %s185_s30, 256, %s187_s8, [#allocation4], %s337_s25, %s337_s25, %s338_s4  }
  0xd4   :  { %334 = dma.done.wait [#allocation4], 256  }
  0xd5   :  { %335 = vsyncadd [#allocation4], 4294967040 }
  0xd6   :  { %197 = vsyncpa [#allocation3], 1 }
  0xd7   :  { %198 = vsyncpa [#allocation6], 1 }
  0xd8   :  { %199 = vsyncpa [#allocation4], 1 }

</bundles_post_ra>
